<compile_context>
chip_gen: v6e
topology: v6e:2x2x1
jax: 0.10.0
libtpu: 0.0.40
codegen_flags: <defaults>
</compile_context>

<pallas_src>
import functools

import jax
import jax.numpy as jnp
from jax.experimental import pallas as pl
from jax.experimental.pallas import tpu as pltpu


def _round_up(x, m):
    return ((x + m - 1) // m) * m


def _head_kernel(x_ref, w_ref, b_ref, o_ref, acc_ref, *, inv_s, n_chunks, rag_len):
    # x_ref  : (tn, tc, s_pad) tile of the flattened (N, C, T*H*W) input (bf16/f32)
    # w_ref  : (tc, K_pad)     proj weight rows for this channel tile, (C, K) layout
    # b_ref  : (1, K_pad)      proj bias, zero-padded on K
    # o_ref  : (tn, K_pad)     output logits tile (block index constant over c axis)
    # acc_ref: (tn, K_pad)     f32 accumulator, resident over the channel grid axis
    c_idx = pl.program_id(1)

    @pl.when(c_idx == 0)
    def _init():
        acc_ref[...] = jnp.zeros_like(acc_ref)

    tn, tc, _ = x_ref.shape
    rag_chunk = n_chunks - 1 if rag_len else -1

    def load_chunk(ck):
        # 128-aligned static slice; per-chunk widen bounds live f32 temporaries.
        chunk = x_ref[:, :, ck * 128:(ck + 1) * 128].astype(jnp.float32)
        if ck == rag_chunk:
            # Only the single ragged chunk of the padded S extent is masked, so
            # the mean stays unbiased and padding garbage cannot poison the sum.
            lane = jax.lax.broadcasted_iota(jnp.int32, (tn, tc, 128), 2)
            chunk = jnp.where(lane < rag_len, chunk, 0.0)
        return chunk

    # pool (lane fold): collapse s_pad lanes down to 128 with pure VPU adds; two
    # independent accumulators let the VALUs co-issue on longer chains.
    partial = load_chunk(0)
    if n_chunks >= 4:
        partial2 = load_chunk(1)
        for ck in range(2, n_chunks):
            if ck % 2 == 0:
                partial = partial + load_chunk(ck)
            else:
                partial2 = partial2 + load_chunk(ck)
        partial = partial + partial2
    else:
        for ck in range(1, n_chunks):
            partial = partial + load_chunk(ck)

    # pool (finish): AdaptiveAvgPool3d(1) == mean over (T, H, W).
    pooled = partial.sum(axis=-1) * inv_s                     # (tn, tc)

    # dropout: identity in eval mode.  activation: None.
    # proj (partial over this channel tile): pooled @ W[c_tile]  (pre-transposed
    # weight -> contract lhs dim 1 with rhs dim 0, no in-kernel relayout).
    acc_ref[...] += jax.lax.dot_general(
        pooled, w_ref[...],
        dimension_numbers=(((1,), (0,)), ((), ())),
        preferred_element_type=jnp.float32)                   # (tn, K_pad)

    @pl.when(c_idx == pl.num_programs(1) - 1)
    def _finalize():
        # output_pool over (1,1,1) spatial + view(N, -1) => identity after global pool.
        o_ref[...] = (acc_ref[...] + b_ref[...]).astype(o_ref.dtype)


def video_resnet_head(x, w, b, *, tn=None, tc=None, vmem_budget=None):
    """VideoResNetHead forward.

    x: (N, C, T, H, W) float32 or bfloat16; w: (K, C); b: (K,).  Returns (N, K) f32.
    """
    N, C, T, H, W = x.shape
    K = w.shape[0]
    S = T * H * W
    s_pad = _round_up(S, 128)                    # full-S lane tile (never split)
    K_pad = _round_up(K, 128)                    # lane-dense output -> unmasked stores
    n_chunks = s_pad // 128
    rag_len = S % 128                            # valid lanes in the ragged chunk (0 => none)

    x_flat = x.reshape(N, C, S)                  # contiguous reshape, no copy
    # Pre-transpose + K-pad the weight once in the wrapper (tiny XLA op).
    w_p = jnp.pad(jnp.transpose(w.astype(jnp.float32)), ((0, 0), (0, K_pad - K)))
    b_p = jnp.pad(b.astype(jnp.float32), (0, K_pad - K)).reshape(1, K_pad)

    # ---- VMEM budget (per core) ----------------------------------------------
    try:
        vmem_cap = int(pltpu.get_tpu_info().vmem_capacity_bytes)
    except Exception:
        vmem_cap = 64 * 1024 * 1024              # conservative: v7x per-core VMEM
    if vmem_budget is None:
        vmem_budget = (vmem_cap * 3) // 4        # headroom for compiler temporaries

    itemsize = jnp.dtype(x_flat.dtype).itemsize

    def need_bytes(tn_, tc_):
        return (2 * tn_ * tc_ * s_pad * itemsize  # x slab, double-buffered
                + 2 * tc_ * K_pad * 4             # weight tile, double-buffered
                + 2 * K_pad * 4                   # bias (resident)
                + 2 * tn_ * K_pad * 4             # output tile
                + tn_ * K_pad * 4                 # accumulator scratch
                + 3 * tn_ * tc_ * 128 * 4)        # in-kernel f32 chunk / fold temps

    # ---- tile selection --------------------------------------------------------
    if tn is None:
        if N <= 8:
            tn = N                                # single tile (tn == N is layout-legal)
        else:
            tn = _round_up(pl.cdiv(N, 2), 8)      # >= 2 batch tiles -> both TCs on v7x
    assert tn == N or tn % 8 == 0, "tn must be a multiple of 8 or equal N"

    if tc is None:
        if C % 8 == 0:
            tc_cands = [d for d in range(C, 0, -8) if C % d == 0]  # descending divisors
        else:
            tc_cands = [C]                        # rare; keep full C (layout-legal)
        tc = tc_cands[0]
        # Shrink tc, then tn, until the working set fits; the full-S lane extent
        # is never split, keeping HBM DMA runs long and contiguous.
        while need_bytes(tn, tc) > vmem_budget:
            nxt = next((d for d in tc_cands if d < tc), None)
            if nxt is not None:
                tc = nxt
            elif tn > 8:
                tn = max(8, _round_up(pl.cdiv(tn, 2), 8))
            else:
                break                             # smallest legal tiles; rely on vmem_limit
    assert tc == C or (C % tc == 0 and tc % 8 == 0), \
        "tc must divide C and be a multiple of 8 (or equal C)"

    grid_n = pl.cdiv(N, tn)
    grid_c = C // tc
    need = need_bytes(tn, tc)
    vmem_limit = int(min(vmem_cap, max(2 * need, 32 * 1024 * 1024)))

    kernel = functools.partial(_head_kernel, inv_s=1.0 / S,
                               n_chunks=n_chunks, rag_len=rag_len)

    out = pl.pallas_call(
        kernel,
        out_shape=jax.ShapeDtypeStruct((N, K_pad), jnp.float32),
        grid_spec=pltpu.PrefetchScalarGridSpec(
            num_scalar_prefetch=0,
            grid=(grid_n, grid_c),                 # channel (reduction) axis last
            in_specs=[
                pl.BlockSpec((tn, tc, s_pad), lambda i, c: (i, c, 0)),  # x slab (full S)
                pl.BlockSpec((tc, K_pad), lambda i, c: (c, 0)),         # weight tile
                pl.BlockSpec((1, K_pad), lambda i, c: (0, 0)),          # bias (resident)
            ],
            out_specs=pl.BlockSpec((tn, K_pad), lambda i, c: (i, 0)),
            scratch_shapes=[pltpu.VMEM((tn, K_pad), jnp.float32)],
        ),
        compiler_params=pltpu.CompilerParams(
            dimension_semantics=("parallel", "arbitrary"),
            vmem_limit_bytes=vmem_limit,
        ),
    )(x_flat, w_p, b_p)

    return out[:, :K]


def _reference(x, w, b):
    # Pure-JAX mirror of the PyTorch forward for the same head configuration.
    pooled = jnp.mean(x.astype(jnp.float32), axis=(2, 3, 4))
    return pooled @ w.astype(jnp.float32).T + b.astype(jnp.float32)


if __name__ == "__main__":
    key = jax.random.PRNGKey(0)
    init_std = 0.01

    # Config A: bf16 activations, ragged S = 4*7*7 = 196, two batch tiles
    # (megacore-friendly on v7x), full-S contiguous slab per DMA.
    N, C, T, H, W, K = 16, 8, 4, 7, 7, 16
    k1, k2, k3 = jax.random.split(key, 3)
    x = jax.random.normal(k1, (N, C, T, H, W), dtype=jnp.float32)
    # init_net_weights(..., init_std, 'resnet'): Linear weight ~ N(0, init_std), bias = 0
    w = init_std * jax.random.normal(k2, (K, C), dtype=jnp.float32)
    b = jnp.zeros((K,), dtype=jnp.float32)
    x_bf16 = x.astype(jnp.bfloat16)              # bf16 activations halve HBM traffic
    out = jax.block_until_ready(video_resnet_head(x_bf16, w, b))
    ref = _reference(x_bf16, w, b)
    assert out.shape == (N, K)
    assert jnp.allclose(out, ref, atol=2e-3, rtol=2e-2), "config A mismatch"

    # Config B: f32 input, S a multiple of 128 (no masking), tiny batch (tn == N),
    # K not a multiple of 128, nonzero bias.
    N2, C2, T2, H2, W2, K2 = 2, 8, 4, 8, 8, 10
    k4, k5, k6 = jax.random.split(k3, 3)
    x2 = jax.random.normal(k4, (N2, C2, T2, H2, W2), dtype=jnp.float32)
    w2 = init_std * jax.random.normal(k5, (K2, C2), dtype=jnp.float32)
    b2 = 0.01 * jnp.ones((K2,), dtype=jnp.float32)
    out2 = jax.block_until_ready(video_resnet_head(x2, w2, b2))
    ref2 = _reference(x2, w2, b2)
    assert out2.shape == (N2, K2)
    assert jnp.allclose(out2, ref2, atol=2e-3, rtol=2e-2), "config B mismatch"

    # Config C: channel-tiled reduction (tc override -> grid_c = 4) exercising the
    # accumulator init/accumulate/finalize path, plus a ragged batch tile (N=12, tn=8)
    # and ragged S = 2*7*7 = 98.
    N3, C3, T3, H3, W3, K3 = 12, 32, 2, 7, 7, 20
    k7, k8 = jax.random.split(k6)
    x3 = jax.random.normal(k7, (N3, C3, T3, H3, W3), dtype=jnp.float32)
    w3 = init_std * jax.random.normal(k8, (K3, C3), dtype=jnp.float32)
    b3 = 0.01 * jnp.ones((K3,), dtype=jnp.float32)
    out3 = jax.block_until_ready(video_resnet_head(x3, w3, b3, tc=8))
    ref3 = _reference(x3, w3, b3)
    assert out3.shape == (N3, K3)
    assert jnp.allclose(out3, ref3, atol=2e-3, rtol=2e-2), "config C mismatch"

    print("KERNEL_OK")
</pallas_src>

<mosaic_0001>
module attributes {stable_mosaic.version = 11 : i64} {
  func.func @_head_kernel(%arg0: i32, %arg1: i32, %arg2: memref<8x8x256xbf16, #tpu.memory_space<vmem>>, %arg3: memref<8x128xf32, #tpu.memory_space<vmem>>, %arg4: memref<1x128xf32, #tpu.memory_space<vmem>>, %arg5: memref<8x128xf32, #tpu.memory_space<vmem>>, %arg6: memref<8x128xf32, #tpu.memory_space<vmem>>) attributes {dimension_semantics = [#tpu.dimension_semantics<parallel>, #tpu.dimension_semantics<arbitrary>], iteration_bounds = array<i64: 2, 1>, scalar_prefetch = 0 : i64, scratch_operands = 1 : i64, tpu.core_type = #tpu.core_type<tc>, window_params = [{transform_indices = @transform_0, window_bounds = array<i64: 8, 8, 256>}, {transform_indices = @transform_1, window_bounds = array<i64: 8, 128>}, {pipeline_mode = #tpu.pipeline_mode<synchronous>, transform_indices = @transform_2, window_bounds = array<i64: 1, 128>}, {transform_indices = @transform_3, window_bounds = array<i64: 8, 128>}]} {
    %c0_i32 = arith.constant 0 : i32
    %0 = arith.cmpi eq, %arg1, %c0_i32 : i32
    %1 = arith.extui %0 : i1 to i32
    %c0_i32_0 = arith.constant 0 : i32
    %2 = arith.cmpi ne, %1, %c0_i32_0 : i32
    scf.if %2 {
      %cst_16 = arith.constant 0.000000e+00 : f32
      %24 = vector.broadcast %cst_16 : f32 to vector<8x128xf32>
      %c0_17 = arith.constant 0 : index
      %c0_18 = arith.constant 0 : index
      %25 = vector.load %arg6[%c0_17, %c0_18] : memref<8x128xf32, #tpu.memory_space<vmem>>, vector<8x128xf32>
      tpu.vector_store %arg6[%c0_17, %c0_18], %24 {strides = array<i32>} : memref<8x128xf32, #tpu.memory_space<vmem>>, vector<8x128xf32>,
    } else {
    }
    %c0 = arith.constant 0 : index
    %c0_1 = arith.constant 0 : index
    %c0_2 = arith.constant 0 : index
    %3 = vector.load %arg2[%c0, %c0_1, %c0_2] : memref<8x8x256xbf16, #tpu.memory_space<vmem>>, vector<8x8x128xbf16>
    %4 = arith.extf %3 : vector<8x8x128xbf16> to vector<8x8x128xf32>
    %c0_3 = arith.constant 0 : index
    %c0_4 = arith.constant 0 : index
    %c128 = arith.constant 128 : index
    %5 = vector.load %arg2[%c0_3, %c0_4, %c128] : memref<8x8x256xbf16, #tpu.memory_space<vmem>>, vector<8x8x128xbf16>
    %6 = arith.extf %5 : vector<8x8x128xbf16> to vector<8x8x128xf32>
    %7 = tpu.iota {dimensions = array<i32: 2>} : vector<8x8x128xi32>
    %c68_i32 = arith.constant 68 : i32
    %8 = vector.broadcast %c68_i32 : i32 to vector<8x8x128xi32>
    %9 = arith.cmpi slt, %7, %8 : vector<8x8x128xi32>
    %cst = arith.constant 0.000000e+00 : f32
    %10 = vector.broadcast %cst : f32 to vector<8x8x128xf32>
    %11 = arith.select %9, %6, %10 : vector<8x8x128xi1>, vector<8x8x128xf32>
    %12 = arith.addf %4, %11 : vector<8x8x128xf32>
    %cst_5 = arith.constant dense<0.000000e+00> : vector<8x8xf32>
    %13 = vector.multi_reduction <add>, %12, %cst_5 [2] : vector<8x8x128xf32> to vector<8x8xf32>
    %cst_6 = arith.constant 0.00510204071 : f32
    %14 = vector.broadcast %cst_6 : f32 to vector<8x8xf32>
    %15 = arith.mulf %13, %14 : vector<8x8xf32>
    %c0_7 = arith.constant 0 : index
    %c0_8 = arith.constant 0 : index
    %16 = vector.load %arg6[%c0_7, %c0_8] : memref<8x128xf32, #tpu.memory_space<vmem>>, vector<8x128xf32>
    %c0_9 = arith.constant 0 : index
    %c0_10 = arith.constant 0 : index
    %17 = vector.load %arg3[%c0_9, %c0_10] : memref<8x128xf32, #tpu.memory_space<vmem>>, vector<8x128xf32>
    %cst_11 = arith.constant dense<0.000000e+00> : vector<8x128xf32>
    %18 = tpu.matmul %15, %17, %cst_11 {dimension_numbers = #tpu.dot_dimension_numbers<[1], [0], [0], [1], [0, 0, 1, 1], [], []>} : vector<8x8xf32>, vector<8x128xf32>, vector<8x128xf32> -> vector<8x128xf32>
    %19 = arith.addf %16, %18 : vector<8x128xf32>
    %c0_12 = arith.constant 0 : index
    %c0_13 = arith.constant 0 : index
    %20 = vector.load %arg6[%c0_12, %c0_13] : memref<8x128xf32, #tpu.memory_space<vmem>>, vector<8x128xf32>
    tpu.vector_store %arg6[%c0_12, %c0_13], %19 {strides = array<i32>} : memref<8x128xf32, #tpu.memory_space<vmem>>, vector<8x128xf32>,
    %c0_i32_14 = arith.constant 0 : i32
    %21 = arith.cmpi eq, %arg1, %c0_i32_14 : i32
    %22 = arith.extui %21 : i1 to i32
    %c0_i32_15 = arith.constant 0 : i32
    %23 = arith.cmpi ne, %22, %c0_i32_15 : i32
    scf.if %23 {
      %c0_16 = arith.constant 0 : index
      %c0_17 = arith.constant 0 : index
      %24 = vector.load %arg6[%c0_16, %c0_17] : memref<8x128xf32, #tpu.memory_space<vmem>>, vector<8x128xf32>
      %c0_18 = arith.constant 0 : index
      %c0_19 = arith.constant 0 : index
      %25 = vector.load %arg4[%c0_18, %c0_19] : memref<1x128xf32, #tpu.memory_space<vmem>>, vector<1x128xf32>
      %26 = vector.broadcast %25 : vector<1x128xf32> to vector<8x128xf32>
      %27 = arith.addf %24, %26 : vector<8x128xf32>
      %c0_20 = arith.constant 0 : index
      %c0_21 = arith.constant 0 : index
      %28 = vector.load %arg5[%c0_20, %c0_21] : memref<8x128xf32, #tpu.memory_space<vmem>>, vector<8x128xf32>
      tpu.vector_store %arg5[%c0_20, %c0_21], %27 {strides = array<i32>} : memref<8x128xf32, #tpu.memory_space<vmem>>, vector<8x128xf32>,
    } else {
    }
    return
  }
  func.func @transform_0(%arg0: i32, %arg1: i32) -> (i32, i32, i32) {
    %c0_i32 = arith.constant 0 : i32
    %c0_i32_0 = arith.constant 0 : i32
    return %arg0, %arg1, %c0_i32 : i32, i32, i32
  }
  func.func @transform_1(%arg0: i32, %arg1: i32) -> (i32, i32) {
    %c0_i32 = arith.constant 0 : i32
    %c0_i32_0 = arith.constant 0 : i32
    return %arg1, %c0_i32 : i32, i32
  }
  func.func @transform_2(%arg0: i32, %arg1: i32) -> (i32, i32) {
    %c0_i32 = arith.constant 0 : i32
    %c0_i32_0 = arith.constant 0 : i32
    %c0_i32_1 = arith.constant 0 : i32
    return %c0_i32, %c0_i32_0 : i32, i32
  }
  func.func @transform_3(%arg0: i32, %arg1: i32) -> (i32, i32) {
    %c0_i32 = arith.constant 0 : i32
    %c0_i32_0 = arith.constant 0 : i32
    return %arg0, %c0_i32 : i32, i32
  }
}

</mosaic_0001>

<bundles_post_ra>
// kernel: tpu_custom_call.1
= control target key start
LH: loop header
LB: loop body
LE: loop exit
PB: predicated region body
PF: predicated region fallthrough
CT: control target
= control target key end

     0   :  { %s1031_s0 = inlined_call_operand.hbm [shape: bf16[16,8,196], index: 0, kind: input, shape index: {}]   ;;  %s1032_s1 = inlined_call_operand.hbm [shape: f32[8,128], index: 1, kind: input, shape index: {}]   ;;  %s1033_s2 = inlined_call_operand.vmem [shape: f32[1,128], index: 2, kind: input, shape index: {}]   ;;  %s1034_s3 = inlined_call_operand.hbm [shape: f32[16,128], index: 3, kind: output, shape index: {}]  }
   0x1   :  { %1037 = sst [smem:[#allocation12_spill]] %s1032_s1 }
   0x2   :  { %8 = vsyncpa [#allocation4], 0 }
   0x3   :  { %10 = vsyncpa [#allocation4 + $0x1], 0 }
   0x4   :  { %11 = vsyncpa [#allocation7], 0 }
   0x5   :  { %12 = vsyncpa [#allocation5], 0 }
   0x6   :  { %14 = vsyncpa [#allocation5 + $0x1], 0  ;;  %s830_s12 = smov 0   ;;  %s832_s13 = smov 0  }
   0x7   :  { %s834_s14 = smov 0   ;;  %s836_s15 = smov 0  }
   0x8   :  { %s838_s16 = smov 0   ;;  %s840_s17 = smov 0  }
   0x9 LB: > { %s558_s18 = sadd.s32 4294967295, %s801_s17   ;;  %s559_s19 = sadd.s32 4294967294, %s801_s17   ;;  %s801_s17 = sphi %s840_s17, %s20_s17   ;;  %s797_s16 = sphi %s838_s16, %s1055_s16   ;;  %s793_s15 = sphi %s836_s15, %s1054_s15   ;;  %s789_s14 = sphi %s834_s14, %s1053_s14   ;;  %s785_s13 = sphi %s832_s13, %s1052_s13   ;;  %s781_s12 = sphi %s830_s12, %s1051_s12  }
   0xa   : > { %s41_s20 = sadd.s32 1, %s789_s14  ;;  %p48_p0 = scmp.ne.s32.totalorder %s789_s14, %s785_s13 }
   0xb   : > { %p49_p1 = scmp.eq.s32.totalorder %s801_s17, 0  ;;  %p54_p2 = scmp.ne.s32.totalorder %s785_s13, %s781_s12 }
   0xc   : > { %p868_p3 = scmp.eq.s32.totalorder %s558_s18, 0  ;;  %p125_p4 = scmp.eq.s32.totalorder %s558_s18, 1 }
   0xd   : > { %p872_p5 = por %p49_p1, %p48_p0  ;;  %p131_p6 = scmp.eq.s32.totalorder %s559_s19, 1 }
   0xe   : > { %p878_p7 = por %p868_p3, %p54_p2  ;;  %p882_p8 = por %p125_p4, %p48_p0 }
   0xf   : > { %p886_p9 = por %p131_p6, %p54_p2  ;;  %p560_p10 = scmp.ge.s32.totalorder %s801_s17, 1 }
  0x10   : > { %s1040_s23 = scalar_select %p878_p7, 1, 0 }
  0x11   : > { %s1041_s24 = scalar_select %p882_p8, 1, 0 }
  0x12   : > { %s1042_s25 = scalar_select %p886_p9, 1, 0 }
  0x13   : > { %p138_p11 = scmp.lt.s32.totalorder %s801_s17, 3  ;;  %s803_s27 = smov [#allocation6]  }
  0x14   : > { %s153_s28 = sshll.u32 %s803_s27, 4  ;;  %p607_p1 = scmp.lt.s32.totalorder %s801_s17, 2  ;;  %s154_s28 = int_to_ptr.vmem [resolvable:$true] %s153_s28 }
  0x15   : > { %p893_p13 = pnand %p560_p10, %p138_p11  ;;  %s32_s4 = sadd.s32 1, %s797_s16 }
  0x16   : > { %p902_p4 = pnand %p607_p1, %p872_p5  ;;  %p34_p6 = scmp.ge.s32.totalorder %s32_s4, 2 }
  0x17   : > { %p594_p0 = pneg %p893_p13  ;;  %s167_s5 = sand.u32 1, %s789_s14  }
  0x18   : > { %s674_s6 = scalar_lea.vmem %s154_s28, 128  ;;  %p682_p8 = scmp.lt.s32.totalorder %s154_s28, %s154_s28 }
  0x19   : > { %p908_p2 = pnand %p594_p0, %p868_p3  ;;  %p675_p11 = scmp.ne.s32.totalorder %s154_s28, %s674_s6 }
  0x1a   : > { %p683_p5 = scmp.lt.s32.totalorder %s674_s6, %s674_s6 }
  0x1b   : > { %p665_p10 = pneg %p908_p2 }
  0x1c   : > { %p684_p1 = por %p683_p5, %p682_p8 }
  0x1d   : > { %p677_p12 = pnand %p675_p11, %p665_p10 }
  0x1f   : > { %p678_p9 = pneg %p677_p12 }
  0x21   : > { %p685_p7 = pnand %p684_p1, %p678_p9 }
  0x23   : > { %688 = shalt.err (!%p685_p7)
}
  0x24   : > { %s1046_s1 = sld [smem:[#allocation12_spill]]  ;;  %s1057_s4 = smov (%p34_p6, %s32_s4), 0 }
  0x25   : > { %s563_s9 = sshll.u32 %s167_s5, 6  ;;  %s36_s10 = ssub.s32 %s797_s16, %s1057_s4 }
  0x26   : > { %p39_p12 = scmp.eq.s32.totalorder %s36_s10, 0  ;;  %s578_s11 = sshll.u32 %s797_s16, 10 }
  0x27   : > { %s180_s22 = scalar_lea.hbm %s1031_s0, %s578_s11  ;;  %s171_s27 = scalar_lea.vmem [#allocation3], %s563_s9 }
  0x28   : > { %s181_s30 = sshll.u32 %s171_s27, 4  ;;  %s168_s7 = scalar_lea.sflag [#allocation4], %s167_s5  ;;  %s182_s30 = int_to_ptr.vmem [resolvable:$true] %s181_s30 }
  0x29   : > { %s932_s6 = scalar_select %p39_p12, %s789_s14, %s41_s20  }
  0x2a   : > { %597 = dma.hbm_to_vmem [thread:$0]  (!%p908_p2), %s1046_s1, 128, %s154_s28, [#allocation7]  }
  0x2b   : > { %p691_p7 = pneg %p902_p4  ;;  %s702_s28 = scalar_lea.vmem %s182_s30, 1024 }
  0x2c   : > { %p703_p8 = scmp.ne.s32.totalorder %s182_s30, %s702_s28  ;;  %s804_s8 = smov [#allocation3]  }
  0x2d   : > { %s707_s10 = sshll.u32 %s804_s8, 4  ;;  %s708_s10 = int_to_ptr.vmem [resolvable:$false] %s707_s10 }
  0x2e   : > { %p705_p9 = pnand %p703_p8, %p691_p7  ;;  %s709_s1 = scalar_lea.vmem %s708_s10, 2048 }
  0x2f   : > { %p710_p2 = scmp.lt.s32.totalorder %s182_s30, %s708_s10  ;;  %p711_p6 = scmp.lt.s32.totalorder %s709_s1, %s702_s28 }
  0x30   : > { %p706_p0 = pneg %p705_p9 }
  0x31   : > { %p712_p10 = por %p711_p6, %p710_p2 }
  0x33   : > { %p713_p11 = pnand %p712_p10, %p706_p0 }
  0x35   : > { %716 = shalt.err (!%p713_p11)
}
  0x36   : > { %s805_s9 = smov 128   ;;  %s806_s20 = smov 8  }
  0x37   : > { %601 = dma.hbm_to_vmem [thread:$0]  (!%p902_p4), %s180_s22, 1024, %s182_s30, %s168_s7, %s805_s9, %s805_s9, %s806_s20  }
  0x38   : > { %193 = sbr.rel (%p893_p13) target bundleno = 436 (0x1b4), region = 32  ;;  %s941_s5 = sand.u32 (!%p893_p13), 1, %s785_s13  }
  0x39   : > { %s568_s11 = sshll.u32 (!%p893_p13), %s941_s5, 6  ;;  %s196_s18 = scalar_lea.sflag (!%p893_p13), [#allocation4], %s941_s5 }
  0x3a   : > { %s945_s1 = scalar_lea.vmem (!%p893_p13), [#allocation3], %s568_s11  ;;  %p1047_p5 = scmp.ne.s32.totalorder (!%p893_p13), %s1040_s23, 0 }
  0x3d   : > { %768 = dma.done.wait (%p1047_p5), %s196_s18, 1024  }
  0x3e   : > { %770 = vsyncadd (%p1047_p5), %s196_s18, 4294966272 }
  0x3f   : > { %772 = dma.done.wait (%p868_p3), [#allocation7], 128  }
  0x40   : > { %774 = vsyncadd (%p868_p3), [#allocation7], 4294967168  ;;  %v264_v0 = vlaneseq  ;;  %v232_v4 = vld [vmem:[%s945_s1] sm:$0xff]   ;;  %v234_v5 = vld [vmem:[%s945_s1 + $0x10] sm:$0xff]   ;;  %v807_v45 = vmov 0.0   ;;  %vm808_vm1 = vmmov 0  }
  0x41   : > { %v233_v6 = vld [vmem:[%s945_s1 + $0x8] sm:$0xff]   ;;  %v240_v7 = vunpack.c.l.bf16 %v232_v4  ;;  %v256_v8 = vunpack.c.h.bf16 %v232_v4  ;;  %v242_v9 = vunpack.c.l.bf16 %v234_v5  ;;  %v258_v10 = vunpack.c.h.bf16 %v234_v5  ;;  %v235_v11 = vld [vmem:[%s945_s1 + $0x18] sm:$0xff]   ;;  %v236_v12 = vld [vmem:[%s945_s1 + $0x20] sm:$0xff]   ;;  %581 = vmatprep.subr.mxu0 %v807_v45  ;;  %583 = vmatprep.mubr.msk.f32.mxu0 %vm808_vm1, %v807_v45  ;;  %s570_s21 = sshll.u32 %s941_s5, 3  ;;  %s574_s29 = sshll.u32 %s793_s15, 7 }
  0x42   : > { %v265_v1 = vand.u32 127, %v264_v0  ;;  %v318_v2 = vshrl.u32 %v264_v0, 7  ;;  %v241_v13 = vunpack.c.l.bf16 %v233_v6  ;;  %v257_v14 = vunpack.c.h.bf16 %v233_v6  ;;  %v237_v20 = vld [vmem:[%s945_s1 + $0x28] sm:$0xff]   ;;  %v238_v25 = vld [vmem:[%s945_s1 + $0x30] sm:$0xff]   ;;  %v239_v26 = vld [vmem:[%s945_s1 + $0x38] sm:$0xff]   ;;  %s225_s19 = scalar_lea.vmem [#allocation8], %s570_s21  ;;  %s989_s7 = scalar_lea.hbm %s1034_s3, %s574_s29 }
  0x43   : > { %v243_v15 = vunpack.c.l.bf16 %v235_v11  ;;  %v259_v16 = vunpack.c.h.bf16 %v235_v11  ;;  %v260_v19 = vunpack.c.h.bf16 %v236_v12  ;;  %v244_v27 = vunpack.c.l.bf16 %v236_v12  ;;  %v308_v44 = vld [vmem:[#allocation6] sm:$0xff]  ;;  %s465_s22 = sshll.u32 %s225_s19, 4  ;;  %s452_s28 = scalar_lea.sflag [#allocation5], %s941_s5  ;;  %s466_s22 = int_to_ptr.vmem [resolvable:$true] %s465_s22 }
  0x44   : > { %v955_v3 = vsub.s32 %v265_v1, %v318_v2  ;;  %vm266_vm0 = vcmp.lt.s32.totalorder %v265_v1, 68  ;;  %v245_v30 = vunpack.c.l.bf16 %v237_v20  ;;  %v261_v31 = vunpack.c.h.bf16 %v237_v20  ;;  %582 = vmatpush3.msra.mxu0 %v308_v44  ;;  %s717_s8 = scalar_lea.vmem %s466_s22, 128  ;;  %p1048_p13 = scmp.ne.s32.totalorder %s1041_s24, 0 }
  0x45   : > { %v267_v17 = vsel %vm266_vm0, %v256_v8, 0.0  ;;  %v269_v18 = vsel %vm266_vm0, %v258_v10, 0.0  ;;  %v268_v23 = vsel %vm266_vm0, %v257_v14, 0.0  ;;  %v270_v24 = vsel %vm266_vm0, %v259_v16, 0.0  ;;  %v572_v14 = vld [vmem:[%s1033_s2] ss:$0 sm:$0xff]  ;;  %p718_p3 = scmp.ne.s32.totalorder %s466_s22, %s717_s8 }
  0x46   : > { %v275_v21 = vadd.f32 %v267_v17, %v240_v7  ;;  %v277_v22 = vadd.f32 %v269_v18, %v242_v9  ;;  %v276_v28 = vadd.f32 %v268_v23, %v241_v13  ;;  %v278_v29 = vadd.f32 %v270_v24, %v243_v15  ;;  %s809_s10 = smov [#allocation8]  }
  0x47   : > { %v271_v32 = vsel %vm266_vm0, %v260_v19, 0.0  ;;  %v262_v33 = vunpack.c.h.bf16 %v238_v25  ;;  %v263_v34 = vunpack.c.h.bf16 %v239_v26  ;;  %v272_v35 = vsel %vm266_vm0, %v261_v31, 0.0  ;;  %p719_p4 = pnand %p718_p3, %p1048_p13  ;;  %s721_s15 = sshll.u32 %s809_s10, 4  ;;  %s722_s15 = int_to_ptr.vmem [resolvable:$false] %s721_s15 }
  0x48   : > { %283 = vadd.xlane.f32.xlu0 %v275_v21  ;;  %287 = vadd.xlane.f32.xlu1 %v277_v22  ;;  %v279_v36 = vadd.f32 %v271_v32, %v244_v27  ;;  %v280_v37 = vadd.f32 %v272_v35, %v245_v30  ;;  %v246_v38 = vunpack.c.l.bf16 %v238_v25  ;;  %v247_v39 = vunpack.c.l.bf16 %v239_v26  ;;  %s723_s9 = scalar_lea.vmem %s722_s15, 256  ;;  %p724_p12 = scmp.lt.s32.totalorder %s466_s22, %s722_s15 }
  0x49   : > { %v273_v40 = vsel %vm266_vm0, %v262_v33, 0.0  ;;  %v274_v41 = vsel %vm266_vm0, %v263_v34, 0.0  ;;  %vm349_vm2 = vcmask 1041409   ;;  %vm351_vm3 = vcmask 1042434   ;;  %p720_p1 = pneg %p719_p4  ;;  %p725_p7 = scmp.lt.s32.totalorder %s723_s9, %s717_s8 }
  0x4a   : > { %v281_v42 = vadd.f32 %v273_v40, %v246_v38  ;;  %v282_v43 = vadd.f32 %v274_v41, %v247_v39  ;;  %vm353_vm4 = vcmask 1043459   ;;  %vm355_vm5 = vcmask 1044484  }
  0x4b   : > { %vm357_vm6 = vcmask 1045509   ;;  %vm359_vm7 = vcmask 1046534   ;;  %vm361_vm8 = vcmask 1047559   ;;  %vm363_vm9 = vcmask 64512   ;;  %p726_p8 = por %p725_p7, %p724_p12 }
  0x4c   : > { %285 = vadd.xlane.f32.xlu0 %v276_v28  ;;  %289 = vadd.xlane.f32.xlu1 %v278_v29 }
  0x4d   : > { %p727_p9 = pnand %p726_p8, %p720_p1 }
  0x50   : > { %291 = vadd.xlane.f32.xlu0 %v279_v36  ;;  %293 = vadd.xlane.f32.xlu1 %v280_v37 }
  0x54   : > { %295 = vadd.xlane.f32.xlu0 %v281_v42  ;;  %297 = vadd.xlane.f32.xlu1 %v282_v43 }
  0xd1   : > { %v284_v46 = vpop.xlane.xlu0 %283  ;;  %v288_v47 = vpop.xlane.xlu1 %287 }
  0xd2   : > { %v299_v48 = vmul.f32 0.0051020407, %v284_v46  ;;  %v301_v49 = vmul.f32 0.0051020407, %v288_v47 }
  0xd4   : > { %v320_v54 = vrot.slane %v299_v48, %v955_v3  ;;  %v328_v57 = vrot.slane %v301_v49, %v955_v3 }
  0xd5   : > { %v286_v50 = vpop.xlane.xlu0 %285  ;;  %v290_v51 = vpop.xlane.xlu1 %289 }
  0xd6   : > { %v300_v52 = vmul.f32 0.0051020407, %v286_v50  ;;  %v302_v53 = vmul.f32 0.0051020407, %v290_v51 }
  0xd8   : > { %v324_v55 = vrot.slane %v300_v52, %v955_v3  ;;  %v332_v56 = vrot.slane %v302_v53, %v955_v3 }
  0xd9   : > { %v292_v58 = vpop.xlane.xlu0 %291  ;;  %v294_v59 = vpop.xlane.xlu1 %293 }
  0xda   : > { %v350_v60 = vsel %vm349_vm2, %v324_v55, %v320_v54  ;;  %v303_v61 = vmul.f32 0.0051020407, %v292_v58  ;;  %v304_v62 = vmul.f32 0.0051020407, %v294_v59 }
  0xdb   : > { %v352_v63 = vsel %vm351_vm3, %v328_v57, %v350_v60 }
  0xdc   : > { %v354_v0 = vsel %vm353_vm4, %v332_v56, %v352_v63  ;;  %v336_v1 = vrot.slane %v303_v61, %v955_v3  ;;  %v340_v2 = vrot.slane %v304_v62, %v955_v3 }
  0xdd   : > { %v296_v4 = vpop.xlane.xlu0 %295  ;;  %v298_v5 = vpop.xlane.xlu1 %297 }
  0xde   : > { %v356_v6 = vsel %vm355_vm5, %v336_v1, %v354_v0  ;;  %v305_v7 = vmul.f32 0.0051020407, %v296_v4  ;;  %v306_v8 = vmul.f32 0.0051020407, %v298_v5 }
  0xdf   : > { %v358_v11 = vsel %vm357_vm6, %v340_v2, %v356_v6 }
  0xe0   : > { %v344_v9 = vrot.slane %v305_v7, %v955_v3  ;;  %v348_v10 = vrot.slane %v306_v8, %v955_v3 }
  0xe2   : > { %v360_v12 = vsel %vm359_vm7, %v344_v9, %v358_v11 }
  0xe3   : > { %v362_v13 = vsel %vm361_vm8, %v348_v10, %v360_v12 }
  0xe4   : > { %584 = vmatmul.mubr.msk.f32.vlgmr.msra.gmra.mxu0 %vm363_vm9, %v362_v13 }
 0x1a4   : > { %v432_v15 = vpop.f32.mrf.mxu0 }
 0x1a5   : > { %v449_v16 = vadd.f32 %v572_v14, %v432_v15 }
 0x1a6   : > { %v585_v3 = vpop.f32.mrf.mxu0 }
 0x1a7   : > { %450 = vst [vmem:[%s225_s19] sm:$0xff] %v449_v16 }
 0x1a8   : > { %730 = shalt.err (!%p727_p9)
}
 0x1a9   : > { %s731_s20 = scalar_lea.hbm %s989_s7, 128  ;;  %s735_s18 = scalar_lea.hbm %s1034_s3, 256 }
 0x1aa   : > { %p732_p0 = scmp.ne.s32.totalorder %s989_s7, %s731_s20  ;;  %p736_p10 = scmp.lt.s32.totalorder %s989_s7, %s1034_s3 }
 0x1ab   : > { %p737_p11 = scmp.lt.s32.totalorder %s735_s18, %s731_s20 }
 0x1ac   : > { %p733_p2 = pnand %p732_p0, %p1048_p13 }
 0x1ad   : > { %p738_p5 = por %p737_p11, %p736_p10 }
 0x1ae   : > { %p734_p6 = pneg %p733_p2 }
 0x1b0   : > { %p739_p3 = pnand %p738_p5, %p734_p6 }
 0x1b2   : > { %742 = shalt.err (!%p739_p3)
}
 0x1b3   : > { %592 = dma.vmem_to_hbm [thread:$0]  (%p1048_p13), %s466_s22, 128, %s989_s7, %s452_s28  }
 0x1b4 PF: > { %s477_s23 = sand.u32 1, %s781_s12   ;;  %p1049_p4 = scmp.ne.s32.totalorder %s1042_s25, 0 }
 0x1b5   : > { %p1050_p1 = scmp.ge.s32.totalorder %s801_s17, 2  ;;  %s478_s26 = scalar_lea.sflag [#allocation5], %s477_s23 }
 0x1b7   : > { %p603_p12 = pnand %p1050_p1, %p1049_p4 }
 0x1b9   : > { %p604_p7 = pneg %p603_p12 }
 0x1bb   : > { %776 = dma.done.wait (%p604_p7), %s478_s26, 128  }
 0x1bc   : > { %778 = vsyncadd (%p604_p7), %s478_s26, 4294967168  ;;  %s20_s17 = sadd.s32 1, %s801_s17   ;;  %s1051_s12 = smov %s785_s13 }
 0x1bd   : > { %p17_p8 = scmp.ge.s32.totalorder %s20_s17, 4   ;;  %s1052_s13 = smov %s789_s14 }
 0x1be   : > { %s1053_s14 = smov %s932_s6  ;;  %s1054_s15 = smov %s797_s16 }
 0x1bf   : > { %s1055_s16 = smov %s1057_s4  ;;  %19 = sbr.rel (!%p17_p8) target bundleno = 9 (0x9), region = 90 }
 0x1c4   :  { %483 = vsyncpa [#allocation4], 1 }
 0x1c5   :  { %485 = vsyncpa [#allocation4 + $0x1], 1 }
 0x1c6   :  { %486 = vsyncpa [#allocation7], 1 }
 0x1c7   :  { %487 = vsyncpa [#allocation5], 1 }
 0x1c8   :  { %489 = vsyncpa [#allocation5 + $0x1], 1 }

</bundles_post_ra>
